<compile_context>
chip_gen: v7x
topology: tpu7x:2x2x1
jax: 0.10.0
libtpu: 0.0.40
codegen_flags: <defaults>
</compile_context>

<pallas_src>
import numpy as np
import jax
import jax.numpy as jnp
from jax import lax
from jax.experimental import pallas as pl
from jax.experimental.pallas import tpu as pltpu

NUM_CLASSES = 10              # PreProcessing.NUM_CLASSES (synthetic, deterministic choice)
K = NUM_CLASSES + 1
KP = 128                      # K zero-padded to a full lane tile (lane-dense output)

# Static problem sizes (consistent with fc in_features = 192 = 64 * 3).
N = 2                         # batch
H = 12                        # input height: 12 -> pool 6 -> pool 3; 64 * 3 = 192
W = 8                         # input width
C1 = 32                       # conv1 out channels
C2 = 64                       # conv2 out channels

Hp1 = H + 2                   # conv1 zero-padded input height (14)
H1 = H                        # conv1 output height (12)
W1 = W + 2                    # conv1 output width (10): pad=1, kernel width 1
Hq1 = H1 // 2                 # after first max_pool(2,1): 6
H2 = Hq1                      # conv2 output height (6)
W2 = W1 + 2                   # conv2 output width (12)
Hq2 = H2 // 2                 # after second max_pool(2,1): 3 (final H)
Wf = W2                       # final width (12)

ROWS = W2 * N                 # unified row count, row r = w2 * N + n          (24)
F1 = Hq1 * C1                 # conv1 pooled feature width, col = hq*C1 + c    (192)
F2 = Hq2 * C2                 # conv2 pooled feature width, col = hf*C2 + c2   (192)


def _fused_kernel(x_ref, w1e_ref, w1o_ref, b1_ref, w2e_ref, w2o_ref, b2_ref,
                  wfc_ref, bfc_ref, out_ref):
    x = x_ref[...]                                    # (ROWS, Hp1)
    b1 = b1_ref[...]                                  # (1, F1)

    # conv1 + bias + relu for even / odd output rows, then max-pool over H (one max).
    a_e = jnp.maximum(
        jnp.dot(x, w1e_ref[...], preferred_element_type=jnp.float32) + b1, 0.0)
    a_o = jnp.maximum(
        jnp.dot(x, w1o_ref[...], preferred_element_type=jnp.float32) + b1, 0.0)
    p1 = jnp.maximum(a_e, a_o)                        # (ROWS, F1)

    # conv2 width padding: rows w2==0 and w2==W2-1 must be exactly zero entering
    # conv2 (conv1 left relu(b1) there since their input rows are zero).
    r = lax.broadcasted_iota(jnp.int32, (ROWS, F1), 0)
    p1 = jnp.where((r >= N) & (r < ROWS - N), p1, 0.0)

    # conv2 (H zero-padding folded into the banded weights) + bias + relu + pool.
    b2 = b2_ref[...]                                  # (1, F2)
    c_e = jnp.maximum(
        jnp.dot(p1, w2e_ref[...], preferred_element_type=jnp.float32) + b2, 0.0)
    c_o = jnp.maximum(
        jnp.dot(p1, w2o_ref[...], preferred_element_type=jnp.float32) + b2, 0.0)
    p2 = jnp.maximum(c_e, c_o)                        # (ROWS, F2)

    # fc: lane-dense (ROWS, 128) output, classes zero-padded to 128.
    out_ref[...] = (jnp.dot(p2, wfc_ref[...], preferred_element_type=jnp.float32)
                    + bfc_ref[...])


def neural_net_audio_phase_two(x, w1, b1, w2, b2, wfc, bfc):
    """x: (N, 1, H, W) float32 in PyTorch NCHW. Params in PyTorch layouts."""
    f32 = jnp.float32

    # ---- input slab: rows = (conv2-output width w2, batch n), cols = padded H ------
    xpad = jnp.pad(x.astype(f32), ((0, 0), (0, 0), (1, 1), (1, 1)))[:, 0]  # (N,Hp1,W1)
    xcols = jnp.transpose(xpad, (2, 0, 1)).reshape(W1 * N, Hp1)            # rows=(w1,n)
    zrow = jnp.zeros((N, Hp1), f32)
    x2d = jnp.concatenate([zrow, xcols, zrow], axis=0)                     # (ROWS, Hp1)

    # ---- conv1 weights as banded (Hp1, F1) matrices, split by pooled-row parity ----
    w1k = jnp.transpose(w1[:, 0, :, 0], (1, 0)).astype(f32)                # (3, C1)
    sel1 = np.zeros((3, Hp1, H1), np.float32)                              # hp == h1+kh
    for kh in range(3):
        sel1[kh, kh:kh + H1, :] = np.eye(H1, dtype=np.float32)
    w1full = jnp.einsum('kph,kc->phc', jnp.asarray(sel1), w1k)             # (Hp1,H1,C1)
    w1e = w1full[:, 0::2, :].reshape(Hp1, F1)                              # h1 = 2*hq
    w1o = w1full[:, 1::2, :].reshape(Hp1, F1)                              # h1 = 2*hq+1
    b1big = jnp.tile(b1.astype(f32), Hq1).reshape(1, F1)

    # ---- conv2 weights as banded (F1, F2) matrices (H zero-padding folded in) ------
    w2k = jnp.transpose(w2[:, :, :, 0], (2, 1, 0)).astype(f32)             # (3, C1, C2)
    sel2 = np.zeros((3, Hq1, H2), np.float32)                              # hq == h2+kh-1
    for kh in range(3):
        for h2 in range(H2):
            hq = h2 + kh - 1
            if 0 <= hq < Hq1:
                sel2[kh, hq, h2] = 1.0
    w2full = jnp.einsum('kqh,kab->qahb', jnp.asarray(sel2), w2k)           # (Hq1,C1,H2,C2)
    w2e = w2full[:, :, 0::2, :].reshape(F1, F2)
    w2o = w2full[:, :, 1::2, :].reshape(F1, F2)
    b2big = jnp.tile(b2.astype(f32), Hq2).reshape(1, F2)

    # ---- fc weights: torch feature f = c2*Hq2 + hf  ->  rows ordered hf*C2 + c2 ----
    wfcr = jnp.transpose(wfc.astype(f32).reshape(K, C2, Hq2), (2, 1, 0)).reshape(F2, K)
    wfcr = jnp.pad(wfcr, ((0, 0), (0, KP - K)))                            # (F2, KP)
    bfcp = jnp.pad(bfc.astype(f32), (0, KP - K)).reshape(1, KP)

    out2d = pl.pallas_call(
        _fused_kernel,
        out_shape=jax.ShapeDtypeStruct((ROWS, KP), jnp.float32),
        in_specs=[pl.BlockSpec(memory_space=pltpu.MemorySpace.VMEM)] * 9,
        out_specs=pl.BlockSpec(memory_space=pltpu.MemorySpace.VMEM),
    )(x2d, w1e, w1o, b1big, w2e, w2o, b2big, wfcr, bfcp)

    # Rows are already (w2, n)-major: reshape and drop the zero-padded class columns.
    # Matches PyTorch's (W_final, N, K) output.
    return out2d.reshape(Wf, N, KP)[:, :, :K]


def _torch_style_reference(x, w1, b1, w2, b2, wfc, bfc):
    """Independent pure-JAX reference mirroring the PyTorch forward."""
    dn = ('NCHW', 'OIHW', 'NCHW')
    y = lax.conv_general_dilated(x, w1, (1, 1), ((1, 1), (1, 1)), dimension_numbers=dn)
    y = jax.nn.relu(y + b1[None, :, None, None])
    y = lax.reduce_window(y, -jnp.inf, lax.max, (1, 1, 2, 1), (1, 1, 2, 1), 'VALID')
    y = lax.conv_general_dilated(y, w2, (1, 1), ((1, 1), (1, 1)), dimension_numbers=dn)
    y = jax.nn.relu(y + b2[None, :, None, None])
    y = lax.reduce_window(y, -jnp.inf, lax.max, (1, 1, 2, 1), (1, 1, 2, 1), 'VALID')
    y = jnp.transpose(y, (3, 0, 1, 2))                      # (Wf, N, C, Hf)
    y = y.reshape(y.shape[0], y.shape[1], -1)               # (Wf, N, C*Hf)
    return y @ wfc.T + bfc


if __name__ == "__main__":
    key = jax.random.PRNGKey(0)
    ks = jax.random.split(key, 7)
    x = jax.random.normal(ks[0], (N, 1, H, W), jnp.float32)
    w1 = jax.random.normal(ks[1], (C1, 1, 3, 1), jnp.float32) * 0.1
    b1 = jax.random.normal(ks[2], (C1,), jnp.float32) * 0.1
    w2 = jax.random.normal(ks[3], (C2, C1, 3, 1), jnp.float32) * 0.1
    b2 = jax.random.normal(ks[4], (C2,), jnp.float32) * 0.1
    wfc = jax.random.normal(ks[5], (K, C2 * Hq2), jnp.float32) * 0.1
    bfc = jax.random.normal(ks[6], (K,), jnp.float32) * 0.1

    fwd = jax.jit(neural_net_audio_phase_two)
    out = jax.block_until_ready(fwd(x, w1, b1, w2, b2, wfc, bfc))

    ref = _torch_style_reference(x, w1, b1, w2, b2, wfc, bfc)
    assert out.shape == (Wf, N, K), out.shape
    if not jnp.allclose(out, ref, atol=2e-4, rtol=2e-4):
        max_err = jnp.max(jnp.abs(out - ref))
        raise AssertionError(f"Pallas kernel output does not match reference (max err {max_err})")

    print("KERNEL_OK")
</pallas_src>

<mosaic_0001>
module attributes {stable_mosaic.version = 11 : i64} {
  func.func @_fused_kernel(%arg0: memref<24x14xf32, #tpu.memory_space<vmem>>, %arg1: memref<14x192xf32, #tpu.memory_space<vmem>>, %arg2: memref<14x192xf32, #tpu.memory_space<vmem>>, %arg3: memref<1x192xf32, #tpu.memory_space<vmem>>, %arg4: memref<192x192xf32, #tpu.memory_space<vmem>>, %arg5: memref<192x192xf32, #tpu.memory_space<vmem>>, %arg6: memref<1x192xf32, #tpu.memory_space<vmem>>, %arg7: memref<192x128xf32, #tpu.memory_space<vmem>>, %arg8: memref<1x128xf32, #tpu.memory_space<vmem>>, %arg9: memref<24x128xf32, #tpu.memory_space<vmem>>) attributes {dimension_semantics = [], scalar_prefetch = 0 : i64, scratch_operands = 0 : i64, tpu.core_type = #tpu.core_type<tc>} {
    %c0 = arith.constant 0 : index
    %c0_0 = arith.constant 0 : index
    %0 = vector.load %arg0[%c0, %c0_0] : memref<24x14xf32, #tpu.memory_space<vmem>>, vector<24x14xf32>
    %c0_1 = arith.constant 0 : index
    %c0_2 = arith.constant 0 : index
    %1 = vector.load %arg3[%c0_1, %c0_2] : memref<1x192xf32, #tpu.memory_space<vmem>>, vector<1x192xf32>
    %c0_3 = arith.constant 0 : index
    %c0_4 = arith.constant 0 : index
    %2 = vector.load %arg1[%c0_3, %c0_4] : memref<14x192xf32, #tpu.memory_space<vmem>>, vector<14x192xf32>
    %cst = arith.constant dense<0.000000e+00> : vector<24x192xf32>
    %3 = tpu.matmul %0, %2, %cst {dimension_numbers = #tpu.dot_dimension_numbers<[1], [0], [0], [1], [0, 0, 1, 1], [], []>} : vector<24x14xf32>, vector<14x192xf32>, vector<24x192xf32> -> vector<24x192xf32>
    %4 = vector.broadcast %1 : vector<1x192xf32> to vector<24x192xf32>
    %5 = arith.addf %3, %4 : vector<24x192xf32>
    %cst_5 = arith.constant 0.000000e+00 : f32
    %6 = vector.broadcast %cst_5 : f32 to vector<24x192xf32>
    %7 = arith.maximumf %5, %6 : vector<24x192xf32>
    %c0_6 = arith.constant 0 : index
    %c0_7 = arith.constant 0 : index
    %8 = vector.load %arg2[%c0_6, %c0_7] : memref<14x192xf32, #tpu.memory_space<vmem>>, vector<14x192xf32>
    %cst_8 = arith.constant dense<0.000000e+00> : vector<24x192xf32>
    %9 = tpu.matmul %0, %8, %cst_8 {dimension_numbers = #tpu.dot_dimension_numbers<[1], [0], [0], [1], [0, 0, 1, 1], [], []>} : vector<24x14xf32>, vector<14x192xf32>, vector<24x192xf32> -> vector<24x192xf32>
    %10 = vector.broadcast %1 : vector<1x192xf32> to vector<24x192xf32>
    %11 = arith.addf %9, %10 : vector<24x192xf32>
    %cst_9 = arith.constant 0.000000e+00 : f32
    %12 = vector.broadcast %cst_9 : f32 to vector<24x192xf32>
    %13 = arith.maximumf %11, %12 : vector<24x192xf32>
    %14 = arith.maximumf %7, %13 : vector<24x192xf32>
    %15 = tpu.iota {dimensions = array<i32: 0>} : vector<24x192xi32>
    %c2_i32 = arith.constant 2 : i32
    %16 = vector.broadcast %c2_i32 : i32 to vector<24x192xi32>
    %17 = arith.cmpi sge, %15, %16 : vector<24x192xi32>
    %c22_i32 = arith.constant 22 : i32
    %18 = vector.broadcast %c22_i32 : i32 to vector<24x192xi32>
    %19 = arith.cmpi slt, %15, %18 : vector<24x192xi32>
    %20 = arith.andi %17, %19 : vector<24x192xi1>
    %cst_10 = arith.constant 0.000000e+00 : f32
    %21 = vector.broadcast %cst_10 : f32 to vector<24x192xf32>
    %22 = arith.select %20, %14, %21 : vector<24x192xi1>, vector<24x192xf32>
    %c0_11 = arith.constant 0 : index
    %c0_12 = arith.constant 0 : index
    %23 = vector.load %arg6[%c0_11, %c0_12] : memref<1x192xf32, #tpu.memory_space<vmem>>, vector<1x192xf32>
    %c0_13 = arith.constant 0 : index
    %c0_14 = arith.constant 0 : index
    %24 = vector.load %arg4[%c0_13, %c0_14] : memref<192x192xf32, #tpu.memory_space<vmem>>, vector<192x192xf32>
    %cst_15 = arith.constant dense<0.000000e+00> : vector<24x192xf32>
    %25 = tpu.matmul %22, %24, %cst_15 {dimension_numbers = #tpu.dot_dimension_numbers<[1], [0], [0], [1], [0, 0, 1, 1], [], []>} : vector<24x192xf32>, vector<192x192xf32>, vector<24x192xf32> -> vector<24x192xf32>
    %26 = vector.broadcast %23 : vector<1x192xf32> to vector<24x192xf32>
    %27 = arith.addf %25, %26 : vector<24x192xf32>
    %cst_16 = arith.constant 0.000000e+00 : f32
    %28 = vector.broadcast %cst_16 : f32 to vector<24x192xf32>
    %29 = arith.maximumf %27, %28 : vector<24x192xf32>
    %c0_17 = arith.constant 0 : index
    %c0_18 = arith.constant 0 : index
    %30 = vector.load %arg5[%c0_17, %c0_18] : memref<192x192xf32, #tpu.memory_space<vmem>>, vector<192x192xf32>
    %cst_19 = arith.constant dense<0.000000e+00> : vector<24x192xf32>
    %31 = tpu.matmul %22, %30, %cst_19 {dimension_numbers = #tpu.dot_dimension_numbers<[1], [0], [0], [1], [0, 0, 1, 1], [], []>} : vector<24x192xf32>, vector<192x192xf32>, vector<24x192xf32> -> vector<24x192xf32>
    %32 = vector.broadcast %23 : vector<1x192xf32> to vector<24x192xf32>
    %33 = arith.addf %31, %32 : vector<24x192xf32>
    %cst_20 = arith.constant 0.000000e+00 : f32
    %34 = vector.broadcast %cst_20 : f32 to vector<24x192xf32>
    %35 = arith.maximumf %33, %34 : vector<24x192xf32>
    %36 = arith.maximumf %29, %35 : vector<24x192xf32>
    %c0_21 = arith.constant 0 : index
    %c0_22 = arith.constant 0 : index
    %37 = vector.load %arg7[%c0_21, %c0_22] : memref<192x128xf32, #tpu.memory_space<vmem>>, vector<192x128xf32>
    %cst_23 = arith.constant dense<0.000000e+00> : vector<24x128xf32>
    %38 = tpu.matmul %36, %37, %cst_23 {dimension_numbers = #tpu.dot_dimension_numbers<[1], [0], [0], [1], [0, 0, 1, 1], [], []>} : vector<24x192xf32>, vector<192x128xf32>, vector<24x128xf32> -> vector<24x128xf32>
    %c0_24 = arith.constant 0 : index
    %c0_25 = arith.constant 0 : index
    %39 = vector.load %arg8[%c0_24, %c0_25] : memref<1x128xf32, #tpu.memory_space<vmem>>, vector<1x128xf32>
    %40 = vector.broadcast %39 : vector<1x128xf32> to vector<24x128xf32>
    %41 = arith.addf %38, %40 : vector<24x128xf32>
    %c0_26 = arith.constant 0 : index
    %c0_27 = arith.constant 0 : index
    %42 = vector.load %arg9[%c0_26, %c0_27] : memref<24x128xf32, #tpu.memory_space<vmem>>, vector<24x128xf32>
    tpu.vector_store %arg9[%c0_26, %c0_27], %41 {strides = array<i32>} : memref<24x128xf32, #tpu.memory_space<vmem>>, vector<24x128xf32>,
    return
  }
}

</mosaic_0001>

<bundles_post_ra>
// kernel: tile.13
= control target key start
LH: loop header
LB: loop body
LE: loop exit
PB: predicated region body
PF: predicated region fallthrough
CT: control target
= control target key end

     0   :  { %s22_s0 = inlined_call_operand.vmem [shape: f32[32], index: 0, kind: input, shape index: {}]   ;;  %s23_s1 = inlined_call_operand.vmem [shape: f32[6,32], index: 1, kind: output, shape index: {}]  }
   0x1   :  { %v4_v0 = vld [vmem:[%s22_s0] ss:$0 sm:$0xff] }
   0x2   :  { %5 = vst [vmem:[%s23_s1] sm:$0xff] %v4_v0 }

// kernel: tile.14
= control target key start
LH: loop header
LB: loop body
LE: loop exit
PB: predicated region body
PF: predicated region fallthrough
CT: control target
= control target key end

     0   :  { %s43_s8 = smov 96   ;;  %s19_s9 = smov 3  ;;  %vm4_vm0 = vcmask 261120   ;;  %vm10_vm1 = vcmask 1048320   ;;  %vm16_vm2 = vcmask 785920   ;;  %vm23_vm3 = vcmask 523520   ;;  %s74_s0 = inlined_call_operand.vmem [shape: f32[6,32], index: 0, kind: input, shape index: {}]   ;;  %s75_s1 = inlined_call_operand.vmem [shape: f32[1,192], index: 1, kind: output, shape index: {}]  }
   0x1   :  { %v36_v0 = vld [vmem:[%s74_s0 + $0x3] sm:$0x1]   ;;  %v37_v1 = vld [vmem:[%s74_s0 + $0x2] sm:$0x1]   ;;  %v38_v2 = vld [vmem:[%s74_s0 + $0x1] ss:$4 sm:%s19_s9]  }
   0x2   :  { %8 = vrot.lane.b32.xlu0 %v36_v0, %s43_s8  ;;  %s2_s14 = smov 3  ;;  %s44_s15 = smov 32  }
   0x3   :  { %21 = vrot.lane.b32.xlu1 %v38_v2, %s44_s15  ;;  %v3_v3 = vld [vmem:[%s74_s0] ss:$4 sm:%s2_s14]   ;;  %s45_s0 = smov 64  }
   0x4   :  { %5 = vst.msk [vmem:[#allocation0] ss:$8 sm:$0x3] %vm4_vm0, %v3_v3  }
   0x6   :  { %14 = vrot.lane.b32.xlu0 %v37_v1, %s45_s0 }
  0x74   :  { %v9_v4 = vpop.permute.xlu0 %8  }
  0x75   :  { %11 = vst.msk [vmem:[#allocation0] sm:$0x1] %vm10_vm1, %v9_v4   ;;  %v22_v5 = vpop.permute.xlu1 %21  }
  0x78   :  { %v15_v6 = vpop.permute.xlu0 %14  }
  0x79   :  { %17 = vst.msk [vmem:[#allocation0] sm:$0x1] %vm16_vm2, %v15_v6  }
  0x7a   :  { %24 = vst.msk [vmem:[#allocation0] ss:$8 sm:$0x3] %vm23_vm3, %v22_v5  }
  0x81   :  { %v28_v7 = vld [vmem:[#allocation0] sm:$0x1]  ;;  %v32_v8 = vld [vmem:[#allocation0 + $0x8] sm:$0x1] }
  0x82   :  { %30 = vst [vmem:[%s75_s1] sm:$0x1] %v28_v7  ;;  %39 = vst [vmem:[%s75_s1 + $0x1] sm:$0x1] %v32_v8 }

// kernel: tile.18
= control target key start
LH: loop header
LB: loop body
LE: loop exit
PB: predicated region body
PF: predicated region fallthrough
CT: control target
= control target key end

     0   :  { %s22_s0 = inlined_call_operand.vmem [shape: f32[64], index: 0, kind: input, shape index: {}]   ;;  %s23_s1 = inlined_call_operand.vmem [shape: f32[3,64], index: 1, kind: output, shape index: {}]  }
   0x1   :  { %v4_v0 = vld [vmem:[%s22_s0] ss:$0 sm:$0xff] }
   0x2   :  { %5 = vst [vmem:[%s23_s1] sm:$0xf] %v4_v0 }

// kernel: tile.19
= control target key start
LH: loop header
LB: loop body
LE: loop exit
PB: predicated region body
PF: predicated region fallthrough
CT: control target
= control target key end

     0   :  { %vm8_vm0 = vcmask 523264   ;;  %s29_s8 = smov 64   ;;  %vm14_vm1 = vcmask 1048064   ;;  %s49_s0 = inlined_call_operand.vmem [shape: f32[3,64], index: 0, kind: input, shape index: {}]   ;;  %s50_s1 = inlined_call_operand.vmem [shape: f32[1,192], index: 1, kind: output, shape index: {}]  }
   0x1   :  { %v4_v0 = vld [vmem:[%s49_s0] sm:$0xf]  ;;  %s6_s0 = smov 3 }
   0x2   :  { %5 = vst [vmem:[#allocation1] sm:$0xf] %v4_v0 }
   0x9   :  { %v11_v1 = vld [vmem:[#allocation1 + $0x1] sm:$0x1]   ;;  %v7_v2 = vld [vmem:[#allocation1] ss:$2 sm:%s6_s0]  }
   0xa   :  { %12 = vrot.lane.b32.xlu0 %v11_v1, %s29_s8  ;;  %9 = vst.msk [vmem:[#allocation0] ss:$8 sm:$0x3] %vm8_vm0, %v7_v2  }
  0x11   :  { %v23_v3 = vld [vmem:[#allocation0 + $0x8] sm:$0x1] }
  0x12   :  { %27 = vst [vmem:[%s50_s1 + $0x1] sm:$0x1] %v23_v3 }
  0x7c   :  { %v13_v4 = vpop.permute.xlu0 %12  }
  0x7d   :  { %15 = vst.msk [vmem:[#allocation0] sm:$0x1] %vm14_vm1, %v13_v4  }
  0x84   :  { %v19_v5 = vld [vmem:[#allocation0] sm:$0x1] }
  0x85   :  { %21 = vst [vmem:[%s50_s1] sm:$0x1] %v19_v5 }

// kernel: neural_net_audio_phase_two.1
= control target key start
LH: loop header
LB: loop body
LE: loop exit
PB: predicated region body
PF: predicated region fallthrough
CT: control target
= control target key end

     0   :  { %vm61_vm0 = vcmask 1045504   ;;  %vm881_vm1 = vmmov 1   ;;  %v882_v3 = vmov 0.0   ;;  %vm51_vm3 = vcmask 113664   ;;  %s1418_s1 = inlined_call_operand.vmem [shape: f32[14,192], index: 1, kind: input, shape index: {}]   ;;  %s1419_s2 = inlined_call_operand.vmem [shape: f32[14,192], index: 2, kind: input, shape index: {}]   ;;  %s1420_s0 = inlined_call_operand.vmem [shape: f32[24,14], index: 0, kind: input, shape index: {}]   ;;  %s1421_s4 = inlined_call_operand.vmem [shape: f32[192,192], index: 4, kind: input, shape index: {}]   ;;  %s1422_s5 = inlined_call_operand.vmem [shape: f32[192,192], index: 5, kind: input, shape index: {}]   ;;  %s1423_s3 = inlined_call_operand.vmem [shape: f32[1,192], index: 3, kind: input, shape index: {}]   ;;  %s1424_s7 = inlined_call_operand.vmem [shape: f32[192,128], index: 7, kind: input, shape index: {}]   ;;  %s1425_s6 = inlined_call_operand.vmem [shape: f32[1,192], index: 6, kind: input, shape index: {}]   ;;  %s1426_s8 = inlined_call_operand.vmem [shape: f32[1,128], index: 8, kind: input, shape index: {}]   ;;  %s1427_s9 = inlined_call_operand.vmem [shape: f32[24,128], index: 9, kind: output, shape index: {}]  }
   0x1   :  { %v37_v0 = vld [vmem:[%s1418_s1 + $0x8] sm:$0xff]  ;;  %v39_v1 = vld [vmem:[%s1418_s1 + $0x18] sm:$0x3f]  ;;  %vm940_vm2 = vmpackc.low %vm61_vm0, %vm881_vm1  ;;  %132 = vmatprep.mubr.f32.mxu1 %v882_v3  ;;  %vm341_vm5 = vcmask 523264  }
   0x2   :  { %v734_v4 = vpack.c.bf16 %v39_v1, %v37_v0  ;;  %v36_v5 = vld [vmem:[%s1418_s1] sm:$0xff]  ;;  %v38_v6 = vld [vmem:[%s1418_s1 + $0x10] sm:$0x3f]  ;;  %v158_v8 = vld [vmem:[%s1419_s2 + $0x8] sm:$0xff] }
   0x3   :  { %v737_v7 = vpack.c.bf16 %v38_v6, %v36_v5  ;;  %v160_v9 = vld [vmem:[%s1419_s2 + $0x18] sm:$0x3f]  ;;  %v157_v10 = vld [vmem:[%s1419_s2] sm:$0xff]  ;;  %v159_v13 = vld [vmem:[%s1419_s2 + $0x10] sm:$0x3f] }
   0x4   :  { %736 = vmatprep.subr.msk.bf16.mxu1 %vm940_vm2, %v734_v4  ;;  %v965_v11 = vld [vmem:[%s1420_s0] sm:$0xff]  ;;  %v740_v12 = vpack.c.bf16 %v160_v9, %v158_v8  ;;  %v743_v14 = vpack.c.bf16 %v159_v13, %v157_v10  ;;  %v283_v15 = vld [vmem:[%s1421_s4 + $0x8] sm:$0xff]  ;;  %v285_v16 = vld [vmem:[%s1421_s4 + $0x18] sm:$0xff] }
   0x5   :  { %739 = vmatpush1.bf16.msk.msra.mxu1 %vm940_vm2, %v737_v7  ;;  %v441_v17 = vld [vmem:[%s1422_s5 + $0x8] sm:$0xff]  ;;  %v746_v18 = vpack.c.bf16 %v285_v16, %v283_v15  ;;  %v443_v19 = vld [vmem:[%s1422_s5 + $0x18] sm:$0xff]  ;;  %v282_v20 = vld [vmem:[%s1421_s4] sm:$0xff] }
   0x6   :  { %742 = vmatprep.subr.msk.bf16.mxu1 %vm940_vm2, %v740_v12  ;;  %v284_v21 = vld [vmem:[%s1421_s4 + $0x10] sm:$0xff]  ;;  %v794_v22 = vpack.c.bf16 %v443_v19, %v441_v17  ;;  %v287_v24 = vld [vmem:[%s1421_s4 + $0x28] sm:$0xff]  ;;  %v289_v25 = vld [vmem:[%s1421_s4 + $0x38] sm:$0xff] }
   0x7   :  { %v748_v23 = vpack.c.bf16 %v284_v21, %v282_v20  ;;  %747 = vmatprep.subr.bf16.mxu0 %v746_v18  ;;  %v33_v26 = vld [vmem:[%s1420_s0 + $0x8] sm:$0xff]  ;;  %v750_v27 = vpack.c.bf16 %v289_v25, %v287_v24  ;;  %v286_v28 = vld [vmem:[%s1421_s4 + $0x20] sm:$0xff]  ;;  %v288_v29 = vld [vmem:[%s1421_s4 + $0x30] sm:$0xff] }
   0x8   :  { %712 = vmatmul.mubr.msk.f32.vlgmr.msra.gmra.mrb[0].mxu1 %vm51_vm3, %v965_v11  ;;  %v752_v30 = vpack.c.bf16 %v288_v29, %v286_v28  ;;  %v291_v31 = vld [vmem:[%s1421_s4 + $0x48] sm:$0xff]  ;;  %v293_v32 = vld [vmem:[%s1421_s4 + $0x58] sm:$0xff]  ;;  %v290_v34 = vld [vmem:[%s1421_s4 + $0x40] sm:$0xff] }
   0x9   :  { %745 = vmatpush1.bf16.msk.msra.mxu1 %vm940_vm2, %v743_v14  ;;  %138 = vmatprep.mubr.f32.mxu1 %v882_v3  ;;  %v754_v33 = vpack.c.bf16 %v293_v32, %v291_v31  ;;  %v292_v35 = vld [vmem:[%s1421_s4 + $0x50] sm:$0xff]  ;;  %v295_v37 = vld [vmem:[%s1421_s4 + $0x68] sm:$0xff]  ;;  %v297_v38 = vld [vmem:[%s1421_s4 + $0x78] sm:$0xff] }
   0xa   :  { %795 = vmatprep.subr.bf16.mxu1 %v794_v22  ;;  %749 = vmatpush1.bf16.msra.mxu0 %v748_v23  ;;  %v1029_v36 = vld [vmem:[%s1420_s0 + $0x10] sm:$0xff]  ;;  %v440_v39 = vld [vmem:[%s1422_s5] sm:$0xff]  ;;  %v445_v41 = vld [vmem:[%s1422_s5 + $0x28] sm:$0xff]  ;;  %v756_v42 = vpack.c.bf16 %v292_v35, %v290_v34  ;;  %v758_v44 = vpack.c.bf16 %v297_v38, %v295_v37 }
   0xb   :  { %751 = vmatprep.subr.bf16.mxu0 %v750_v27  ;;  %v442_v40 = vld [vmem:[%s1422_s5 + $0x10] sm:$0xff]  ;;  %v447_v43 = vld [vmem:[%s1422_s5 + $0x38] sm:$0xff]  ;;  %v294_v45 = vld [vmem:[%s1421_s4 + $0x60] sm:$0xff] }
   0xc   :  { %713 = vmatmul.mubr.msk.f32.gmra.mrb[2].mxu1 %vm51_vm3, %v33_v26  ;;  %v296_v46 = vld [vmem:[%s1421_s4 + $0x70] sm:$0xff]  ;;  %v299_v47 = vld [vmem:[%s1421_s4 + $0x88] sm:$0xff]  ;;  %v301_v48 = vld [vmem:[%s1421_s4 + $0x98] sm:$0xff]  ;;  %v796_v49 = vpack.c.bf16 %v442_v40, %v440_v39  ;;  %v798_v50 = vpack.c.bf16 %v447_v43, %v445_v41 }
   0xd   :  { %144 = vmatprep.mubr.f32.mxu1 %v882_v3  ;;  %v444_v51 = vld [vmem:[%s1422_s5 + $0x20] sm:$0xff]  ;;  %v446_v52 = vld [vmem:[%s1422_s5 + $0x30] sm:$0xff]  ;;  %v449_v53 = vld [vmem:[%s1422_s5 + $0x48] sm:$0xff]  ;;  %v760_v54 = vpack.c.bf16 %v296_v46, %v294_v45  ;;  %v762_v56 = vpack.c.bf16 %v301_v48, %v299_v47 }
   0xe   :  { %753 = vmatpush1.bf16.msra.mxu0 %v752_v30  ;;  %v451_v55 = vld [vmem:[%s1422_s5 + $0x58] sm:$0xff]  ;;  %v298_v57 = vld [vmem:[%s1421_s4 + $0x80] sm:$0xff]  ;;  %v300_v58 = vld [vmem:[%s1421_s4 + $0x90] sm:$0xff]  ;;  %v800_v61 = vpack.c.bf16 %v446_v52, %v444_v51 }
   0xf   :  { %755 = vmatprep.subr.bf16.mxu0 %v754_v33  ;;  %v303_v59 = vld [vmem:[%s1421_s4 + $0xa8] sm:$0xff]  ;;  %v305_v60 = vld [vmem:[%s1421_s4 + $0xb8] sm:$0xff]  ;;  %v802_v62 = vpack.c.bf16 %v451_v55, %v449_v53  ;;  %v448_v63 = vld [vmem:[%s1422_s5 + $0x40] sm:$0xff]  ;;  %v764_v2 = vpack.c.bf16 %v300_v58, %v298_v57 }
  0x10   :  { %714 = vmatmul.mubr.msk.f32.gmra.mrb[4].mxu1 %vm51_vm3, %v1029_v36  ;;  %v450_v0 = vld [vmem:[%s1422_s5 + $0x50] sm:$0xff]  ;;  %v453_v1 = vld [vmem:[%s1422_s5 + $0x68] sm:$0xff]  ;;  %v455_v4 = vld [vmem:[%s1422_s5 + $0x78] sm:$0xff]  ;;  %v766_v5 = vpack.c.bf16 %v305_v60, %v303_v59 }
  0x11   :  { %231 = vmatprep.mubr.f32.mxu1 %v882_v3  ;;  %v302_v6 = vld [vmem:[%s1421_s4 + $0xa0] sm:$0xff]  ;;  %v304_v7 = vld [vmem:[%s1421_s4 + $0xb0] sm:$0xff]  ;;  %v307_v8 = vld [vmem:[%s1421_s4 + $0xc8] sm:$0xff]  ;;  %v804_v10 = vpack.c.bf16 %v450_v0, %v448_v63 }
  0x12   :  { %757 = vmatpush1.bf16.msra.mxu0 %v756_v42  ;;  %v309_v9 = vld [vmem:[%s1421_s4 + $0xd8] sm:$0xff]  ;;  %v452_v12 = vld [vmem:[%s1422_s5 + $0x60] sm:$0xff]  ;;  %v454_v13 = vld [vmem:[%s1422_s5 + $0x70] sm:$0xff]  ;;  %v768_v15 = vpack.c.bf16 %v304_v7, %v302_v6 }
  0x13   :  { %759 = vmatprep.subr.bf16.mxu0 %v758_v44  ;;  %v457_v14 = vld [vmem:[%s1422_s5 + $0x88] sm:$0xff]  ;;  %v770_v16 = vpack.c.bf16 %v309_v9, %v307_v8  ;;  %v306_v17 = vld [vmem:[%s1421_s4 + $0xc0] sm:$0xff]  ;;  %v308_v18 = vld [vmem:[%s1421_s4 + $0xd0] sm:$0xff]  ;;  %v808_v19 = vpack.c.bf16 %v454_v13, %v452_v12 }
  0x14   :  { %717 = vmatmul.mubr.msk.f32.vlgmr.msra.gmra.mrb[6].mxu1 %vm51_vm3, %v965_v11  ;;  %v806_v11 = vpack.c.bf16 %v455_v4, %v453_v1  ;;  %v456_v21 = vld [vmem:[%s1422_s5 + $0x80] sm:$0xff]  ;;  %v458_v22 = vld [vmem:[%s1422_s5 + $0x90] sm:$0xff]  ;;  %v772_v23 = vpack.c.bf16 %v308_v18, %v306_v17  ;;  %v461_v24 = vld [vmem:[%s1422_s5 + $0xa8] sm:$0xff] }
  0x15   :  { %237 = vmatprep.mubr.f32.mxu1 %v882_v3  ;;  %797 = vmatpush1.bf16.msra.mxu1 %v796_v49  ;;  %v463_v25 = vld [vmem:[%s1422_s5 + $0xb8] sm:$0xff]  ;;  %v460_v28 = vld [vmem:[%s1422_s5 + $0xa0] sm:$0xff]  ;;  %v462_v29 = vld [vmem:[%s1422_s5 + $0xb0] sm:$0xff] }
  0x16   :  { %799 = vmatprep.subr.bf16.mxu1 %v798_v50  ;;  %761 = vmatpush1.bf16.msra.mxu0 %v760_v54  ;;  %v814_v27 = vpack.c.bf16 %v463_v25, %v461_v24  ;;  %v465_v30 = vld [vmem:[%s1422_s5 + $0xc8] sm:$0xff]  ;;  %v467_v31 = vld [vmem:[%s1422_s5 + $0xd8] sm:$0xff]  ;;  %v816_v32 = vpack.c.bf16 %v462_v29, %v460_v28  ;;  %v464_v34 = vld [vmem:[%s1422_s5 + $0xc0] sm:$0xff] }
  0x17   :  { %763 = vmatprep.subr.bf16.mxu0 %v762_v56  ;;  %v818_v33 = vpack.c.bf16 %v467_v31, %v465_v30  ;;  %v466_v35 = vld [vmem:[%s1422_s5 + $0xd0] sm:$0xff]  ;;  %v311_v37 = vld [vmem:[%s1421_s4 + $0xe8] sm:$0xff]  ;;  %v313_v38 = vld [vmem:[%s1421_s4 + $0xf8] sm:$0xff] }
  0x18   :  { %718 = vmatmul.mubr.msk.f32.gmra.mrb[8].mxu1 %vm51_vm3, %v33_v26  ;;  %v812_v26 = vpack.c.bf16 %v458_v22, %v456_v21  ;;  %v469_v39 = vld [vmem:[%s1422_s5 + $0xe8] sm:$0xff]  ;;  %v774_v40 = vpack.c.bf16 %v313_v38, %v311_v37  ;;  %v471_v41 = vld [vmem:[%s1422_s5 + $0xf8] sm:$0xff]  ;;  %v310_v42 = vld [vmem:[%s1421_s4 + $0xe0] sm:$0xff] }
  0x19   :  { %243 = vmatprep.mubr.f32.mxu1 %v882_v3  ;;  %801 = vmatpush1.bf16.msra.mxu1 %v800_v61  ;;  %v459_v3 = vld [vmem:[%s1422_s5 + $0x98] sm:$0xff]  ;;  %v312_v43 = vld [vmem:[%s1421_s4 + $0xf0] sm:$0xff]  ;;  %v822_v44 = vpack.c.bf16 %v471_v41, %v469_v39  ;;  %v468_v46 = vld [vmem:[%s1422_s5 + $0xe0] sm:$0xff] }
  0x1a   :  { %803 = vmatprep.subr.bf16.mxu1 %v802_v62  ;;  %765 = vmatpush1.bf16.msra.mxu0 %v764_v2  ;;  %v810_v20 = vpack.c.bf16 %v459_v3, %v457_v14  ;;  %v776_v45 = vpack.c.bf16 %v312_v43, %v310_v42  ;;  %v470_v47 = vld [vmem:[%s1422_s5 + $0xf0] sm:$0xff]  ;;  %v315_v49 = vld [vmem:[%s1421_s4 + $0x108] sm:$0xff]  ;;  %v317_v50 = vld [vmem:[%s1421_s4 + $0x118] sm:$0xff] }
  0x1b   :  { %767 = vmatprep.subr.bf16.mxu0 %v766_v5  ;;  %v824_v48 = vpack.c.bf16 %v470_v47, %v468_v46  ;;  %v473_v51 = vld [vmem:[%s1422_s5 + $0x108] sm:$0xff]  ;;  %v778_v52 = vpack.c.bf16 %v317_v50, %v315_v49  ;;  %v475_v53 = vld [vmem:[%s1422_s5 + $0x118] sm:$0xff]  ;;  %v314_v54 = vld [vmem:[%s1421_s4 + $0x100] sm:$0xff] }
  0x1c   :  { %719 = vmatmul.mubr.msk.f32.gmra.mrb[10].mxu1 %vm51_vm3, %v1029_v36  ;;  %v820_v36 = vpack.c.bf16 %v466_v35, %v464_v34  ;;  %v316_v55 = vld [vmem:[%s1421_s4 + $0x110] sm:$0xff]  ;;  %v826_v56 = vpack.c.bf16 %v475_v53, %v473_v51  ;;  %v472_v58 = vld [vmem:[%s1422_s5 + $0x100] sm:$0xff]  ;;  %v319_v61 = vld [vmem:[%s1421_s4 + $0x128] sm:$0xff]  ;;  %v41_v34 = vlaneseq }
  0x1d   :  { %805 = vmatpush1.bf16.msra.mxu1 %v804_v10  ;;  %v780_v57 = vpack.c.bf16 %v316_v55, %v314_v54  ;;  %v474_v59 = vld [vmem:[%s1422_s5 + $0x110] sm:$0xff]  ;;  %v321_v62 = vld [vmem:[%s1421_s4 + $0x138] sm:$0xff]  ;;  %v477_v63 = vld [vmem:[%s1422_s5 + $0x128] sm:$0xff] }
  0x1e   :  { %807 = vmatprep.subr.bf16.mxu1 %v806_v11  ;;  %769 = vmatpush1.bf16.msra.mxu0 %v768_v15  ;;  %v828_v60 = vpack.c.bf16 %v474_v59, %v472_v58  ;;  %v782_v0 = vpack.c.bf16 %v321_v62, %v319_v61  ;;  %v479_v1 = vld [vmem:[%s1422_s5 + $0x138] sm:$0xff]  ;;  %v318_v2 = vld [vmem:[%s1421_s4 + $0x120] sm:$0xff]  ;;  %v320_v4 = vld [vmem:[%s1421_s4 + $0x130] sm:$0xff]  ;;  %v1288_v35 = vshrl.u32 %v41_v34, 7 }
  0x1f   :  { %771 = vmatprep.subr.bf16.mxu0 %v770_v16  ;;  %v830_v5 = vpack.c.bf16 %v479_v1, %v477_v63  ;;  %v784_v6 = vpack.c.bf16 %v320_v4, %v318_v2  ;;  %v476_v7 = vld [vmem:[%s1422_s5 + $0x120] sm:$0xff]  ;;  %v478_v8 = vld [vmem:[%s1422_s5 + $0x130] sm:$0xff]  ;;  %v323_v10 = vld [vmem:[%s1421_s4 + $0x148] sm:$0xff] }
  0x20   :  { %v832_v9 = vpack.c.bf16 %v478_v8, %v476_v7  ;;  %v325_v11 = vld [vmem:[%s1421_s4 + $0x158] sm:$0xff]  ;;  %v481_v12 = vld [vmem:[%s1422_s5 + $0x148] sm:$0xff]  ;;  %v322_v15 = vld [vmem:[%s1421_s4 + $0x140] sm:$0xff]  ;;  %v43_v38 = vsub.s32 0, %v1288_v35  ;;  %vm266_vm4 = vcmp.ge.s32.totalorder %v1288_v35, 2 }
  0x21   :  { %809 = vmatpush1.bf16.msra.mxu1 %v808_v19  ;;  %v786_v13 = vpack.c.bf16 %v325_v11, %v323_v10  ;;  %v483_v14 = vld [vmem:[%s1422_s5 + $0x158] sm:$0xff]  ;;  %v324_v3 = vld [vmem:[%s1421_s4 + $0x150] sm:$0xff]  ;;  %v480_v18 = vld [vmem:[%s1422_s5 + $0x140] sm:$0xff] }
  0x22   :  { %811 = vmatprep.subr.bf16.mxu1 %v810_v20  ;;  %773 = vmatpush1.bf16.msra.mxu0 %v772_v23  ;;  %v834_v16 = vpack.c.bf16 %v483_v14, %v481_v12  ;;  %v788_v17 = vpack.c.bf16 %v324_v3, %v322_v15  ;;  %v482_v19 = vld [vmem:[%s1422_s5 + $0x150] sm:$0xff]  ;;  %v327_v21 = vld [vmem:[%s1421_s4 + $0x168] sm:$0xff]  ;;  %v329_v22 = vld [vmem:[%s1421_s4 + $0x178] sm:$0xff] }
  0x23   :  { %775 = vmatprep.subr.bf16.mxu0 %v774_v40  ;;  %v836_v20 = vpack.c.bf16 %v482_v19, %v480_v18  ;;  %v485_v23 = vld [vmem:[%s1422_s5 + $0x168] sm:$0xff]  ;;  %v790_v24 = vpack.c.bf16 %v329_v22, %v327_v21  ;;  %v487_v25 = vld [vmem:[%s1422_s5 + $0x178] sm:$0xff]  ;;  %v484_v30 = vld [vmem:[%s1422_s5 + $0x160] sm:$0xff]  ;;  %v47_v40 = vsub.s32 1, %v1288_v35 }
  0x24   :  { %v838_v28 = vpack.c.bf16 %v487_v25, %v485_v23  ;;  %v486_v31 = vld [vmem:[%s1422_s5 + $0x170] sm:$0xff]  ;;  %v35_v39 = vld [vmem:[%s1423_s3] sm:$0x3]  ;;  %v584_v61 = vld [vmem:[%s1424_s7 + $0x8] sm:$0xff] }
  0x25   :  { %813 = vmatpush1.bf16.msra.mxu1 %v812_v26  ;;  %v326_v26 = vld [vmem:[%s1421_s4 + $0x160] sm:$0xff]  ;;  %v44_v43 = vrot.slane %v35_v39, %v43_v38  ;;  %v586_v14 = vld [vmem:[%s1424_s7 + $0x18] sm:$0xff] }
  0x26   :  { %815 = vmatprep.subr.bf16.mxu1 %v814_v27  ;;  %777 = vmatpush1.bf16.msra.mxu0 %v776_v45  ;;  %v328_v27 = vld [vmem:[%s1421_s4 + $0x170] sm:$0xff]  ;;  %v587_v25 = vld [vmem:[%s1424_s7 + $0x20] sm:$0xff] }
  0x27   :  { %779 = vmatprep.subr.bf16.mxu0 %v778_v52  ;;  %v792_v29 = vpack.c.bf16 %v328_v27, %v326_v26  ;;  %v588_v26 = vld [vmem:[%s1424_s7 + $0x28] sm:$0xff] }
  0x29   :  { %817 = vmatpush1.bf16.msra.mxu1 %v816_v32  ;;  %v840_v32 = vpack.c.bf16 %v486_v31, %v484_v30  ;;  %v589_v31 = vld [vmem:[%s1424_s7 + $0x30] sm:$0xff] }
  0x2a   :  { %819 = vmatprep.subr.bf16.mxu1 %v818_v33  ;;  %781 = vmatpush1.bf16.msra.mxu0 %v780_v57  ;;  %v883_v33 = vmov 0.0|0.0  }
  0x2b   :  { %783 = vmatprep.subr.bf16.mxu0 %v782_v0 }
  0x2d   :  { %821 = vmatpush1.bf16.msra.mxu1 %v820_v36 }
  0x2e   :  { %823 = vmatprep.subr.bf16.mxu1 %v822_v44  ;;  %785 = vmatpush1.bf16.msra.mxu0 %v784_v6  ;;  %v48_v44 = vrot.slane %v35_v39, %v47_v40 }
  0x2f   :  { %787 = vmatprep.subr.bf16.mxu0 %v786_v13  ;;  %v585_v13 = vld [vmem:[%s1424_s7 + $0x10] sm:$0xff] }
  0x30   :  { %v846_v22 = vpack.c.bf16 %v586_v14, %v585_v13 }
  0x31   :  { %825 = vmatpush1.bf16.msra.mxu1 %v824_v48 }
  0x32   :  { %827 = vmatprep.subr.bf16.mxu1 %v826_v56  ;;  %789 = vmatpush1.bf16.msra.mxu0 %v788_v17  ;;  %v265_v17 = vadd.s32 16, %v1288_v35 }
  0x33   :  { %791 = vmatprep.subr.bf16.mxu0 %v790_v24 }
  0x34   :  { %vm271_vm6 = vcmp.lt.s32.totalorder %v265_v17, 22 }
  0x35   :  { %829 = vmatpush1.bf16.msra.mxu1 %v828_v60  ;;  %v583_v60 = vld [vmem:[%s1424_s7] sm:$0xff] }
  0x36   :  { %831 = vmatprep.subr.bf16.mxu1 %v830_v5  ;;  %793 = vmatpush1.bf16.msra.mxu0 %v792_v29  ;;  %v843_v7 = vpack.c.bf16 %v584_v61, %v583_v60  ;;  %v849_v29 = vpack.c.bf16 %v588_v26, %v587_v25  ;;  %v606_v60 = vld [vmem:[%s1424_s7 + $0xb8] sm:$0xff] }
  0x37   :  { %842 = vmatprep.subr.bf16.mxu0 %v883_v33 }
  0x39   :  { %833 = vmatpush1.bf16.msra.mxu1 %v832_v9 }
  0x3a   :  { %835 = vmatprep.subr.bf16.mxu1 %v834_v16 }
  0x3d   :  { %837 = vmatpush1.bf16.msra.mxu1 %v836_v20 }
  0x3e   :  { %839 = vmatprep.subr.bf16.mxu1 %v838_v28 }
  0x41   :  { %841 = vmatpush1.bf16.msra.mxu1 %v840_v32  ;;  %v590_v32 = vld [vmem:[%s1424_s7 + $0x38] sm:$0xff] }
  0x42   :  { %v852_v34 = vpack.c.bf16 %v590_v32, %v589_v31 }
  0xdb   :  { %v134_v36 = vpop.f32.mrb[0].mxu1 }
  0xdc   :  { %v136_v37 = vpop.f32.mrb[1].mxu1  ;;  %v135_v47 = vadd.f32 %v134_v36, %v44_v43  ;;  %v591_v36 = vld [vmem:[%s1424_s7 + $0x40] sm:$0xff] }
  0xdd   :  { %v137_v48 = vadd.f32 %v136_v37, %v48_v44  ;;  %v592_v37 = vld [vmem:[%s1424_s7 + $0x48] sm:$0xff] }
  0xde   :  { %v151_v53 = vmax.f32 %v135_v47, 0.0  ;;  %v855_v39 = vpack.c.bf16 %v592_v37, %v591_v36  ;;  %v597_v47 = vld [vmem:[%s1424_s7 + $0x70] sm:$0xff] }
  0xdf   :  { %v140_v41 = vpop.f32.mrb[2].mxu1  ;;  %v152_v56 = vmax.f32 %v137_v48, 0.0  ;;  %v598_v48 = vld [vmem:[%s1424_s7 + $0x78] sm:$0xff] }
  0xe0   :  { %v142_v42 = vpop.f32.mrb[3].mxu1  ;;  %v141_v54 = vadd.f32 %v140_v41, %v44_v43  ;;  %v593_v41 = vld [vmem:[%s1424_s7 + $0x50] sm:$0xff] }
  0xe1   :  { %v143_v57 = vadd.f32 %v142_v42, %v48_v44  ;;  %v594_v42 = vld [vmem:[%s1424_s7 + $0x58] sm:$0xff] }
  0xe2   :  { %v153_v4 = vmax.f32 %v141_v54, 0.0  ;;  %v602_v54 = vld [vmem:[%s1424_s7 + $0x98] sm:$0xff] }
  0xe3   :  { %v146_v45 = vpop.f32.mrb[4].mxu1  ;;  %v154_v8 = vmax.f32 %v143_v57, 0.0  ;;  %v604_v57 = vld [vmem:[%s1424_s7 + $0xa8] sm:$0xff] }
  0xe4   :  { %v148_v46 = vpop.f32.mrb[5].mxu1  ;;  %v147_v5 = vadd.f32 %v146_v45, %v44_v43  ;;  %v596_v45 = vld [vmem:[%s1424_s7 + $0x68] sm:$0xff] }
  0xe5   :  { %v149_v9 = vadd.f32 %v148_v46, %v48_v44 }
  0xe6   :  { %v155_v20 = vmax.f32 %v147_v5, 0.0 }
  0xe7   :  { %v233_v49 = vpop.f32.mrb[6].mxu1  ;;  %v156_v23 = vmax.f32 %v149_v9, 0.0 }
  0xe8   :  { %v234_v50 = vadd.f32 %v233_v49, %v44_v43  ;;  %v235_v51 = vpop.f32.mrb[7].mxu1  ;;  %v864_v49 = vpack.c.bf16 %v598_v48, %v597_v47 }
  0xe9   :  { %v236_v52 = vadd.f32 %v235_v51, %v48_v44  ;;  %v600_v51 = vld [vmem:[%s1424_s7 + $0x88] sm:$0xff] }
  0xea   :  { %v250_v55 = vmax.f32 %v234_v50, 0.0  ;;  %v599_v50 = vld [vmem:[%s1424_s7 + $0x80] sm:$0xff] }
  0xeb   :  { %v251_v58 = vmax.f32 %v236_v52, 0.0  ;;  %v239_v59 = vpop.f32.mrb[8].mxu1  ;;  %v867_v52 = vpack.c.bf16 %v600_v51, %v599_v50 }
  0xec   :  { %v256_v62 = vmax.f32 %v151_v53, %v250_v55  ;;  %v240_v63 = vadd.f32 %v239_v59, %v44_v43  ;;  %v241_v0 = vpop.f32.mrb[9].mxu1  ;;  %v601_v53 = vld [vmem:[%s1424_s7 + $0x90] sm:$0xff] }
  0xed   :  { %v242_v1 = vadd.f32 %v241_v0, %v48_v44  ;;  %v257_v2 = vmax.f32 %v152_v56, %v251_v58  ;;  %v870_v55 = vpack.c.bf16 %v602_v54, %v601_v53  ;;  %v603_v56 = vld [vmem:[%s1424_s7 + $0xa0] sm:$0xff]  ;;  %v605_v59 = vld [vmem:[%s1424_s7 + $0xb0] sm:$0xff] }
  0xee   :  { %v252_v6 = vmax.f32 %v240_v63, 0.0  ;;  %v873_v58 = vpack.c.bf16 %v604_v57, %v603_v56  ;;  %v876_v61 = vpack.c.bf16 %v606_v60, %v605_v59 }
  0xef   :  { %v253_v10 = vmax.f32 %v242_v1, 0.0  ;;  %v245_v11 = vpop.f32.mrb[10].mxu1  ;;  %v276_v12 = vsel %vm266_vm4, %v257_v2, 0.0 }
  0xf0   :  { %v258_v15 = vmax.f32 %v153_v4, %v252_v6  ;;  %v246_v3 = vadd.f32 %v245_v11, %v44_v43  ;;  %v247_v16 = vpop.f32.mrb[11].mxu1  ;;  %720 = vmatprep.mubr.msk.f32.mxu0 %vm341_vm5, %v276_v12  ;;  %725 = vmatprep.mubr.msk.f32.mxu1 %vm341_vm5, %v276_v12  ;;  %v858_v43 = vpack.c.bf16 %v594_v42, %v593_v41 }
  0xf1   :  { %v259_v18 = vmax.f32 %v154_v8, %v253_v10  ;;  %v248_v19 = vadd.f32 %v247_v16, %v48_v44  ;;  %721 = vmatmul.mubr.msk.f32.vlgmr.msra.gmra.mrb[0].mxu0 %vm266_vm4, %v256_v62  ;;  %726 = vmatmul.mubr.msk.f32.vlgmr.msra.gmra.mrb[12].mxu1 %vm266_vm4, %v256_v62  ;;  %v595_v44 = vld [vmem:[%s1424_s7 + $0x60] sm:$0xff] }
  0xf2   :  { %v254_v21 = vmax.f32 %v246_v3, 0.0  ;;  %844 = vmatpush1.bf16.msra.mxu0 %v843_v7  ;;  %v861_v46 = vpack.c.bf16 %v596_v45, %v595_v44  ;;  %v281_v62 = vld [vmem:[%s1425_s6] sm:$0x3] }
  0xf3   :  { %v255_v24 = vmax.f32 %v248_v19, 0.0  ;;  %722 = vmatprep.mubr.msk.f32.mxu0 %vm341_vm5, %v259_v18  ;;  %727 = vmatprep.mubr.msk.f32.mxu1 %vm341_vm5, %v259_v18  ;;  %v334_v63 = vrot.slane %v281_v62, %v43_v38 }
  0xf4   :  { %v260_v27 = vmax.f32 %v155_v20, %v254_v21  ;;  %845 = vmatprep.subr.bf16.mxu0 %v883_v33 }
  0xf5   :  { %v261_v28 = vmax.f32 %v156_v23, %v255_v24  ;;  %422 = vmatmul.mubr.f32.gmra.mrb[2].mxu0 %v258_v15  ;;  %559 = vmatmul.mubr.f32.gmra.mrb[14].mxu1 %v258_v15 }
  0xf6   :  { %847 = vmatpush1.bf16.msra.mxu0 %v846_v22 }
  0xf7   :  { %v280_v30 = vsel %vm271_vm6, %v261_v28, 0.0  ;;  %848 = vmatprep.subr.bf16.mxu0 %v883_v33 }
  0xf8   :  { %723 = vmatprep.mubr.msk.f32.mxu0 %vm341_vm5, %v280_v30  ;;  %728 = vmatprep.mubr.msk.f32.mxu1 %vm341_vm5, %v280_v30 }
  0xf9   :  { %724 = vmatmul.mubr.msk.f32.gmra.mrb[4].mxu0 %vm271_vm6, %v260_v27  ;;  %729 = vmatmul.mubr.msk.f32.gmra.mrb[16].mxu1 %vm271_vm6, %v260_v27 }
  0xfa   :  { %850 = vmatpush1.bf16.msra.mxu0 %v849_v29 }
  0xfb   :  { %851 = vmatprep.subr.bf16.mxu0 %v883_v33 }
  0xfe   :  { %853 = vmatpush1.bf16.msra.mxu0 %v852_v34 }
  0xff   :  { %854 = vmatprep.subr.bf16.mxu0 %v883_v33 }
 0x102   :  { %856 = vmatpush1.bf16.msra.mxu0 %v855_v39 }
 0x103   :  { %857 = vmatprep.subr.bf16.mxu0 %v883_v33 }
 0x106   :  { %859 = vmatpush1.bf16.msra.mxu0 %v858_v43  ;;  %v730_v43 = vld [vmem:[%s1426_s8] ss:$0 sm:$0xff] }
 0x107   :  { %860 = vmatprep.subr.bf16.mxu0 %v883_v33 }
 0x10a   :  { %862 = vmatpush1.bf16.msra.mxu0 %v861_v46 }
 0x10b   :  { %863 = vmatprep.subr.bf16.mxu0 %v883_v33 }
 0x10e   :  { %865 = vmatpush1.bf16.msra.mxu0 %v864_v49 }
 0x10f   :  { %866 = vmatprep.subr.bf16.mxu0 %v883_v33 }
 0x112   :  { %868 = vmatpush1.bf16.msra.mxu0 %v867_v52 }
 0x113   :  { %869 = vmatprep.subr.bf16.mxu0 %v883_v33 }
 0x116   :  { %871 = vmatpush1.bf16.msra.mxu0 %v870_v55 }
 0x117   :  { %872 = vmatprep.subr.bf16.mxu0 %v883_v33 }
 0x11a   :  { %874 = vmatpush1.bf16.msra.mxu0 %v873_v58 }
 0x11b   :  { %875 = vmatprep.subr.bf16.mxu0 %v883_v33  ;;  %v338_v33 = vrot.slane %v281_v62, %v47_v40 }
 0x11e   :  { %877 = vmatpush1.bf16.msra.mxu0 %v876_v61 }
 0x1c4   :  { %v417_v0 = vpop.f32.mrb[0].mxu0  ;;  %v554_v1 = vpop.f32.mrb[12].mxu1 }
 0x1c5   :  { %v418_v2 = vadd.f32 %v417_v0, %v334_v63  ;;  %v555_v4 = vadd.f32 %v554_v1, %v334_v63  ;;  %v419_v5 = vpop.f32.mrb[1].mxu0  ;;  %v556_v6 = vpop.f32.mrb[13].mxu1 }
 0x1c6   :  { %v420_v7 = vadd.f32 %v419_v5, %v338_v33  ;;  %v557_v8 = vadd.f32 %v556_v6, %v338_v33 }
 0x1c7   :  { %v434_v9 = vmax.f32 %v418_v2, 0.0  ;;  %v571_v10 = vmax.f32 %v555_v4, 0.0 }
 0x1c8   :  { %v435_v11 = vmax.f32 %v420_v7, 0.0  ;;  %v572_v12 = vmax.f32 %v557_v8, 0.0  ;;  %v423_v13 = vpop.f32.mrb[2].mxu0  ;;  %v560_v14 = vpop.f32.mrb[14].mxu1 }
 0x1c9   :  { %v577_v15 = vmax.f32 %v434_v9, %v571_v10  ;;  %v424_v3 = vadd.f32 %v423_v13, %v334_v63  ;;  %v561_v38 = vadd.f32 %v560_v14, %v334_v63  ;;  %v425_v16 = vpop.f32.mrb[3].mxu0  ;;  %v562_v35 = vpop.f32.mrb[15].mxu1 }
 0x1ca   :  { %v578_v40 = vmax.f32 %v435_v11, %v572_v12  ;;  %v426_v17 = vadd.f32 %v425_v16, %v338_v33  ;;  %v563_v18 = vadd.f32 %v562_v35, %v338_v33 }
 0x1cb   :  { %v436_v19 = vmax.f32 %v424_v3, 0.0  ;;  %v573_v20 = vmax.f32 %v561_v38, 0.0 }
 0x1cc   :  { %v437_v21 = vmax.f32 %v426_v17, 0.0  ;;  %v574_v22 = vmax.f32 %v563_v18, 0.0  ;;  %v429_v23 = vpop.f32.mrb[4].mxu0  ;;  %v566_v24 = vpop.f32.mrb[16].mxu1  ;;  %731 = vmatprep.mubr.msk.f32.mxu0 %vm341_vm5, %v578_v40 }
 0x1cd   :  { %v579_v25 = vmax.f32 %v436_v19, %v573_v20  ;;  %v430_v26 = vadd.f32 %v429_v23, %v334_v63  ;;  %v567_v27 = vadd.f32 %v566_v24, %v334_v63  ;;  %v431_v28 = vpop.f32.mrb[5].mxu0  ;;  %v568_v29 = vpop.f32.mrb[17].mxu1  ;;  %688 = vmatmul.mubr.f32.vlgmr.msra.gmra.mrb[6].mxu0 %v577_v15 }
 0x1ce   :  { %v580_v30 = vmax.f32 %v437_v21, %v574_v22  ;;  %v432_v31 = vadd.f32 %v431_v28, %v338_v33  ;;  %v569_v32 = vadd.f32 %v568_v29, %v338_v33 }
 0x1cf   :  { %v438_v34 = vmax.f32 %v430_v26, 0.0  ;;  %v575_v36 = vmax.f32 %v567_v27, 0.0 }
 0x1d0   :  { %v439_v37 = vmax.f32 %v432_v31, 0.0  ;;  %v576_v39 = vmax.f32 %v569_v32, 0.0  ;;  %732 = vmatprep.mubr.msk.f32.mxu0 %vm341_vm5, %v580_v30 }
 0x1d1   :  { %v581_v41 = vmax.f32 %v438_v34, %v575_v36  ;;  %693 = vmatmul.mubr.f32.gmra.mrb[8].mxu0 %v579_v25 }
 0x1d2   :  { %v582_v42 = vmax.f32 %v439_v37, %v576_v39 }
 0x1d4   :  { %733 = vmatprep.mubr.msk.f32.mxu0 %vm341_vm5, %v582_v42 }
 0x1d5   :  { %698 = vmatmul.mubr.f32.gmra.mrb[10].mxu0 %v581_v41 }
 0x2a0   :  { %v689_v44 = vpop.f32.mrb[6].mxu0 }
 0x2a1   :  { %v690_v45 = vadd.f32 %v730_v43, %v689_v44  ;;  %v691_v46 = vpop.f32.mrb[7].mxu0 }
 0x2a3   :  { %703 = vst [vmem:[%s1427_s9] sm:$0xff] %v690_v45 }
 0x2a4   :  { %v694_v47 = vpop.f32.mrb[8].mxu0 }
 0x2a5   :  { %v695_v48 = vadd.f32 %v730_v43, %v694_v47  ;;  %v696_v49 = vpop.f32.mrb[9].mxu0 }
 0x2a7   :  { %704 = vst [vmem:[%s1427_s9 + $0x8] sm:$0xff] %v695_v48 }
 0x2a8   :  { %v699_v50 = vpop.f32.mrb[10].mxu0 }
 0x2a9   :  { %v700_v51 = vadd.f32 %v730_v43, %v699_v50  ;;  %v701_v52 = vpop.f32.mrb[11].mxu0 }
 0x2ab   :  { %705 = vst [vmem:[%s1427_s9 + $0x10] sm:$0xff] %v700_v51 }

</bundles_post_ra>
